<compile_context>
chip_gen: v6e
topology: v6e:2x2x1
jax: 0.10.0
libtpu: 0.0.40
codegen_flags: <defaults>
</compile_context>

<pallas_src>
import jax
import jax.numpy as jnp
from jax.experimental import pallas as pl
from jax.experimental.pallas import tpu as pltpu


def _round_up(x: int, m: int) -> int:
    return ((x + m - 1) // m) * m


def _cdiv(a: int, b: int) -> int:
    return -(-a // b)


def _make_pass1_kernel(th: int, w: int, hv: int):
    """Pass-1 kernel for a row-tile height `th` (multiple of 8)."""
    wv = w - 2  # 'valid' conv output width

    def kernel(main_ref, halo_ref, mag_ref, pmin_ref, pmax_ref):
        t = pl.program_id(1)

        # Identical 3x3 kernel per input channel => channel-sum first (exact).
        m = main_ref[0]                    # (3, th, w)  image rows [t*th, t*th+th)
        hl = halo_ref[0]                   # (3, 8,  w)  image rows just below the tile
        s_main = m[0] + m[1] + m[2]        # (th, w)
        s_halo = hl[0] + hl[1] + hl[2]     # (8,  w)
        # Both operands are 8-row (sublane) aligned -> cheap aligned concat.
        s = jnp.concatenate([s_main, s_halo], axis=0)    # (th + 8, w)

        # Separable, sparse Sobel taps (zero taps skipped, x2 done as add).
        r0 = s[0:th]
        r1 = s[1:th + 1]
        r2 = s[2:th + 2]
        v121 = r0 + r1 + r1 + r2           # vertical [1, 2, 1]   (for Gx)
        vd = r0 - r2                       # vertical [1, 0, -1]  (for Gy)

        gx = v121[:, 0:wv] - v121[:, 2:wv + 2]            # horizontal [1, 0, -1]
        c1 = vd[:, 1:wv + 1]
        gy = vd[:, 0:wv] + c1 + c1 + vd[:, 2:wv + 2]      # horizontal [1, 2, 1]

        res = jnp.sqrt(gx * gx + gy * gy)  # (th, wv)
        mag_ref[0] = res                   # rows >= hv are boundary-masked by Pallas

        # Per-tile min/max partials.  Rows >= hv only exist because of the
        # row-tile round-up -> they may hold garbage (boundary-block reads);
        # mask them out of the reduction (jnp.where also kills any NaN there).
        row = t * th + jax.lax.broadcasted_iota(jnp.int32, (th, wv), 0)
        valid = row < hv
        tmin = jnp.min(jnp.where(valid, res, jnp.inf))
        tmax = jnp.max(jnp.where(valid, res, -jnp.inf))
        pmin_ref[...] = jnp.full((1, 1, 8, 128), tmin, jnp.float32)
        pmax_ref[...] = jnp.full((1, 1, 8, 128), tmax, jnp.float32)

    return kernel


def sobel_filter(img, *, vmem_target_bytes: int = 2 * 1024 * 1024):
    """Pallas-TPU forward of the PyTorch SobelFilter: (N,3,H,W) f32 -> (N,1,H,W) f32."""
    img = jnp.asarray(img, jnp.float32)
    n, c, h, w = img.shape
    if c != 3:
        raise ValueError("SobelFilter expects 3 input channels")
    if h < 3 or w < 3:
        raise ValueError("spatial dims must be >= 3 for a 'valid' 3x3 conv")

    hv, wv = h - 2, w - 2  # 'valid' conv output size

    # ---- row-tile height -----------------------------------------------------
    # Target ~2 MiB for the 3-channel, full-width main input block: with 2x
    # double-buffered inputs + output + temporaries this stays comfortably inside
    # the 32 MiB scoped VMEM limit on every chip, while being big enough to
    # amortise the ~0.35us per-grid-step overhead and sit at the HBM roofline.
    # Full-width blocks keep the lane dim dense.
    row_bytes = 3 * w * 4
    th_target = max(8, min(512, (vmem_target_bytes // row_bytes) // 8 * 8))
    n_tiles = _cdiv(hv, th_target)
    th = _round_up(_cdiv(hv, n_tiles), 8)   # th <= th_target, multiple of 8
    # Invariants (provable): n_tiles == cdiv(hv, th), (n_tiles-1)*th < hv <= n_tiles*th,
    # so every main/output block index starts in-bounds; only the last block may be
    # a partially out-of-range boundary block (handled by Pallas masking).

    halo_blk = th // 8                      # halo index stride in 8-row blocks
    max_halo_blk = (h - 1) // 8             # last fully-addressable 8-row block
    # If the last tile genuinely needs rows beyond its main block, the unclamped
    # index (t+1)*halo_blk is exactly min(...)==(t+1)*halo_blk and points at the
    # block containing rows H-2..H-1.  Otherwise the clamp only changes rows that
    # feed masked outputs.

    kernel = _make_pass1_kernel(th, w, hv)

    mag, pmin, pmax = pl.pallas_call(
        kernel,
        grid=(n, n_tiles),
        in_specs=[
            # main row tile: image rows [t*th, (t+1)*th)
            pl.BlockSpec((1, 3, th, w), lambda b, t: (b, 0, t, 0)),
            # bottom halo: 8 sublane-aligned rows starting at (t+1)*th, clamped to
            # stay in-bounds (only the first 2 rows are ever consumed by valid
            # outputs) -> ~8/th extra input traffic instead of 2x.
            pl.BlockSpec(
                (1, 3, 8, w),
                lambda b, t: (b, 0, jnp.minimum((t + 1) * halo_blk, max_halo_blk), 0),
            ),
        ],
        out_specs=[
            pl.BlockSpec((1, th, wv), lambda b, t: (b, t, 0)),
            pl.BlockSpec((1, 1, 8, 128), lambda b, t: (b, t, 0, 0)),
            pl.BlockSpec((1, 1, 8, 128), lambda b, t: (b, t, 0, 0)),
        ],
        out_shape=[
            jax.ShapeDtypeStruct((n, hv, wv), jnp.float32),           # |grad|
            jax.ShapeDtypeStruct((n, n_tiles, 8, 128), jnp.float32),  # tile mins
            jax.ShapeDtypeStruct((n, n_tiles, 8, 128), jnp.float32),  # tile maxs
        ],
        compiler_params=pltpu.CompilerParams(
            # both grid axes are fully independent -> shard across v7x's 2 TCs
            dimension_semantics=("parallel", "parallel"),
            vmem_limit_bytes=32 * 1024 * 1024,
        ),
    )(img, img)

    # ---- pass 2: global normalisation + 1-pixel replicate pad ----------------
    mn = jnp.min(pmin)
    mx = jnp.max(pmax)
    # torch: res -= res.min(); res /= res.max()   (max after subtraction == mx-mn)
    # One scalar reciprocal + broadcast multiply; a flat image (mx == mn) yields
    # inf/nan exactly like the reference.
    inv_range = 1.0 / (mx - mn)
    core = (mag - mn) * inv_range                          # (N, H-2, W-2)
    # Trivial streaming tail left to fused XLA: edge padding only replicates
    # values so it commutes with the normalisation; the singleton channel dim is
    # free metadata.
    out = jnp.pad(core, ((0, 0), (1, 1), (1, 1)), mode="edge")
    return out[:, None, :, :]


def _sobel_reference(img):
    """Pure-JAX/XLA reference mirroring the PyTorch module."""
    img = jnp.asarray(img, jnp.float32)
    kx = jnp.array([[1.0, 0.0, -1.0], [2.0, 0.0, -2.0], [1.0, 0.0, -1.0]], jnp.float32)
    ky = jnp.array([[1.0, 2.0, 1.0], [0.0, 0.0, 0.0], [-1.0, -2.0, -1.0]], jnp.float32)
    s = img.sum(axis=1)                    # identical weights per channel
    n, h, w = s.shape
    gx = jnp.zeros((n, h - 2, w - 2), jnp.float32)
    gy = jnp.zeros((n, h - 2, w - 2), jnp.float32)
    for i in range(3):
        for j in range(3):
            win = s[:, i:i + h - 2, j:j + w - 2]
            gx = gx + kx[i, j] * win
            gy = gy + ky[i, j] * win
    gx = jnp.pad(gx, ((0, 0), (1, 1), (1, 1)), mode="edge")
    gy = jnp.pad(gy, ((0, 0), (1, 1), (1, 1)), mode="edge")
    res = jnp.sqrt(gx * gx + gy * gy)
    res = res - jnp.min(res)
    res = res / jnp.max(res)
    return res[:, None, :, :]


if __name__ == "__main__":
    key = jax.random.PRNGKey(0)
    img = jax.random.uniform(key, (2, 3, 16, 16), dtype=jnp.float32)

    out = jax.jit(sobel_filter)(img)
    jax.block_until_ready(out)

    assert out.shape == (2, 1, 16, 16)
    assert out.dtype == jnp.float32

    ref = _sobel_reference(img)
    max_err = float(jnp.max(jnp.abs(out - ref)))
    assert jnp.allclose(out, ref, atol=2e-5, rtol=2e-5), max_err

    print("KERNEL_OK")
</pallas_src>

<mosaic_0001>
module attributes {stable_mosaic.version = 11 : i64} {
  func.func @kernel(%arg0: i32, %arg1: i32, %arg2: memref<1x3x16x16xf32, #tpu.memory_space<vmem>>, %arg3: memref<1x3x8x16xf32, #tpu.memory_space<vmem>>, %arg4: memref<1x16x14xf32, #tpu.memory_space<vmem>>, %arg5: memref<1x1x8x128xf32, #tpu.memory_space<vmem>>, %arg6: memref<1x1x8x128xf32, #tpu.memory_space<vmem>>) attributes {dimension_semantics = [#tpu.dimension_semantics<parallel>, #tpu.dimension_semantics<parallel>], iteration_bounds = array<i64: 2, 1>, scalar_prefetch = 0 : i64, scratch_operands = 0 : i64, tpu.core_type = #tpu.core_type<tc>, window_params = [{transform_indices = @transform_0, window_bounds = array<i64: 1, 3, 16, 16>}, {transform_indices = @transform_1, window_bounds = array<i64: 1, 3, 8, 16>}, {transform_indices = @transform_2, window_bounds = array<i64: 1, 16, 14>}, {transform_indices = @transform_3, window_bounds = array<i64: 1, 1, 8, 128>}, {transform_indices = @transform_4, window_bounds = array<i64: 1, 1, 8, 128>}]} {
    %c0 = arith.constant 0 : index
    %c0_0 = arith.constant 0 : index
    %c0_1 = arith.constant 0 : index
    %c0_2 = arith.constant 0 : index
    %0 = vector.load %arg2[%c0, %c0_0, %c0_1, %c0_2] : memref<1x3x16x16xf32, #tpu.memory_space<vmem>>, vector<1x3x16x16xf32>
    %1 = vector.shape_cast %0 : vector<1x3x16x16xf32> to vector<3x16x16xf32>
    %c0_3 = arith.constant 0 : index
    %c0_4 = arith.constant 0 : index
    %c0_5 = arith.constant 0 : index
    %c0_6 = arith.constant 0 : index
    %2 = vector.load %arg3[%c0_3, %c0_4, %c0_5, %c0_6] : memref<1x3x8x16xf32, #tpu.memory_space<vmem>>, vector<1x3x8x16xf32>
    %3 = vector.shape_cast %2 : vector<1x3x8x16xf32> to vector<3x8x16xf32>
    %4 = vector.extract_strided_slice %1 {offsets = [0, 0, 0], sizes = [1, 16, 16], strides = [1, 1, 1]} : vector<3x16x16xf32> to vector<1x16x16xf32>
    %5 = vector.shape_cast %4 : vector<1x16x16xf32> to vector<16x16xf32>
    %6 = vector.extract_strided_slice %1 {offsets = [1, 0, 0], sizes = [1, 16, 16], strides = [1, 1, 1]} : vector<3x16x16xf32> to vector<1x16x16xf32>
    %7 = vector.shape_cast %6 : vector<1x16x16xf32> to vector<16x16xf32>
    %8 = arith.addf %5, %7 : vector<16x16xf32>
    %9 = vector.extract_strided_slice %1 {offsets = [2, 0, 0], sizes = [1, 16, 16], strides = [1, 1, 1]} : vector<3x16x16xf32> to vector<1x16x16xf32>
    %10 = vector.shape_cast %9 : vector<1x16x16xf32> to vector<16x16xf32>
    %11 = arith.addf %8, %10 : vector<16x16xf32>
    %12 = vector.extract_strided_slice %3 {offsets = [0, 0, 0], sizes = [1, 8, 16], strides = [1, 1, 1]} : vector<3x8x16xf32> to vector<1x8x16xf32>
    %13 = vector.shape_cast %12 : vector<1x8x16xf32> to vector<8x16xf32>
    %14 = vector.extract_strided_slice %3 {offsets = [1, 0, 0], sizes = [1, 8, 16], strides = [1, 1, 1]} : vector<3x8x16xf32> to vector<1x8x16xf32>
    %15 = vector.shape_cast %14 : vector<1x8x16xf32> to vector<8x16xf32>
    %16 = arith.addf %13, %15 : vector<8x16xf32>
    %17 = vector.extract_strided_slice %3 {offsets = [2, 0, 0], sizes = [1, 8, 16], strides = [1, 1, 1]} : vector<3x8x16xf32> to vector<1x8x16xf32>
    %18 = vector.shape_cast %17 : vector<1x8x16xf32> to vector<8x16xf32>
    %19 = arith.addf %16, %18 : vector<8x16xf32>
    %20 = tpu.concatenate %11, %19 in 0 : vector<16x16xf32>, vector<8x16xf32> -> vector<24x16xf32>
    %21 = vector.extract_strided_slice %20 {offsets = [0, 0], sizes = [16, 16], strides = [1, 1]} : vector<24x16xf32> to vector<16x16xf32>
    %22 = vector.extract_strided_slice %20 {offsets = [1, 0], sizes = [16, 16], strides = [1, 1]} : vector<24x16xf32> to vector<16x16xf32>
    %23 = vector.extract_strided_slice %20 {offsets = [2, 0], sizes = [16, 16], strides = [1, 1]} : vector<24x16xf32> to vector<16x16xf32>
    %24 = arith.addf %21, %22 : vector<16x16xf32>
    %25 = arith.addf %24, %22 : vector<16x16xf32>
    %26 = arith.addf %25, %23 : vector<16x16xf32>
    %27 = arith.subf %21, %23 : vector<16x16xf32>
    %28 = vector.extract_strided_slice %26 {offsets = [0, 0], sizes = [16, 14], strides = [1, 1]} : vector<16x16xf32> to vector<16x14xf32>
    %29 = vector.extract_strided_slice %26 {offsets = [0, 2], sizes = [16, 14], strides = [1, 1]} : vector<16x16xf32> to vector<16x14xf32>
    %30 = arith.subf %28, %29 : vector<16x14xf32>
    %31 = vector.extract_strided_slice %27 {offsets = [0, 1], sizes = [16, 14], strides = [1, 1]} : vector<16x16xf32> to vector<16x14xf32>
    %32 = vector.extract_strided_slice %27 {offsets = [0, 0], sizes = [16, 14], strides = [1, 1]} : vector<16x16xf32> to vector<16x14xf32>
    %33 = arith.addf %32, %31 : vector<16x14xf32>
    %34 = arith.addf %33, %31 : vector<16x14xf32>
    %35 = vector.extract_strided_slice %27 {offsets = [0, 2], sizes = [16, 14], strides = [1, 1]} : vector<16x16xf32> to vector<16x14xf32>
    %36 = arith.addf %34, %35 : vector<16x14xf32>
    %37 = arith.mulf %30, %30 : vector<16x14xf32>
    %38 = arith.mulf %36, %36 : vector<16x14xf32>
    %39 = arith.addf %37, %38 : vector<16x14xf32>
    %40 = math.sqrt %39 : vector<16x14xf32>
    %c0_7 = arith.constant 0 : index
    %c0_8 = arith.constant 0 : index
    %c0_9 = arith.constant 0 : index
    %41 = vector.load %arg4[%c0_7, %c0_8, %c0_9] : memref<1x16x14xf32, #tpu.memory_space<vmem>>, vector<1x16x14xf32>
    %42 = vector.shape_cast %41 : vector<1x16x14xf32> to vector<16x14xf32>
    %43 = vector.shape_cast %40 : vector<16x14xf32> to vector<1x16x14xf32>
    tpu.vector_store %arg4[%c0_7, %c0_8, %c0_9], %43 {strides = array<i32>} : memref<1x16x14xf32, #tpu.memory_space<vmem>>, vector<1x16x14xf32>,
    %c16_i32 = arith.constant 16 : i32
    %44 = arith.muli %arg1, %c16_i32 : i32
    %45 = tpu.iota {dimensions = array<i32: 0>} : vector<16x14xi32>
    %46 = vector.broadcast %44 : i32 to vector<16x14xi32>
    %47 = arith.addi %46, %45 : vector<16x14xi32>
    %c14_i32 = arith.constant 14 : i32
    %48 = vector.broadcast %c14_i32 : i32 to vector<16x14xi32>
    %49 = arith.cmpi slt, %47, %48 : vector<16x14xi32>
    %cst = arith.constant 0x7F800000 : f32
    %50 = vector.broadcast %cst : f32 to vector<16x14xf32>
    %51 = arith.select %49, %40, %50 : vector<16x14xi1>, vector<16x14xf32>
    %52 = vector.shape_cast %51 : vector<16x14xf32> to vector<1x16x14xf32>
    %cst_10 = arith.constant dense<0x7F800000> : vector<1xf32>
    %53 = vector.multi_reduction <minimumf>, %52, %cst_10 [1, 2] : vector<1x16x14xf32> to vector<1xf32>
    %54 = vector.shape_cast %53 : vector<1xf32> to vector<1x1x1xf32>
    %55 = vector.extract %54[0, 0, 0] : f32 from vector<1x1x1xf32>
    %cst_11 = arith.constant 0xFF800000 : f32
    %56 = vector.broadcast %cst_11 : f32 to vector<16x14xf32>
    %57 = arith.select %49, %40, %56 : vector<16x14xi1>, vector<16x14xf32>
    %58 = vector.shape_cast %57 : vector<16x14xf32> to vector<1x16x14xf32>
    %cst_12 = arith.constant dense<0xFF800000> : vector<1xf32>
    %59 = vector.multi_reduction <maximumf>, %58, %cst_12 [1, 2] : vector<1x16x14xf32> to vector<1xf32>
    %60 = vector.shape_cast %59 : vector<1xf32> to vector<1x1x1xf32>
    %61 = vector.extract %60[0, 0, 0] : f32 from vector<1x1x1xf32>
    %62 = vector.broadcast %55 : f32 to vector<1x1x8x128xf32>
    %c0_13 = arith.constant 0 : index
    %c0_14 = arith.constant 0 : index
    %c0_15 = arith.constant 0 : index
    %c0_16 = arith.constant 0 : index
    %63 = vector.load %arg5[%c0_13, %c0_14, %c0_15, %c0_16] : memref<1x1x8x128xf32, #tpu.memory_space<vmem>>, vector<1x1x8x128xf32>
    tpu.vector_store %arg5[%c0_13, %c0_14, %c0_15, %c0_16], %62 {strides = array<i32>} : memref<1x1x8x128xf32, #tpu.memory_space<vmem>>, vector<1x1x8x128xf32>,
    %64 = vector.broadcast %61 : f32 to vector<1x1x8x128xf32>
    %c0_17 = arith.constant 0 : index
    %c0_18 = arith.constant 0 : index
    %c0_19 = arith.constant 0 : index
    %c0_20 = arith.constant 0 : index
    %65 = vector.load %arg6[%c0_17, %c0_18, %c0_19, %c0_20] : memref<1x1x8x128xf32, #tpu.memory_space<vmem>>, vector<1x1x8x128xf32>
    tpu.vector_store %arg6[%c0_17, %c0_18, %c0_19, %c0_20], %64 {strides = array<i32>} : memref<1x1x8x128xf32, #tpu.memory_space<vmem>>, vector<1x1x8x128xf32>,
    return
  }
  func.func @transform_0(%arg0: i32, %arg1: i32) -> (i32, i32, i32, i32) {
    %c0_i32 = arith.constant 0 : i32
    %c0_i32_0 = arith.constant 0 : i32
    %c0_i32_1 = arith.constant 0 : i32
    return %arg0, %c0_i32, %arg1, %c0_i32_0 : i32, i32, i32, i32
  }
  func.func @transform_1(%arg0: i32, %arg1: i32) -> (i32, i32, i32, i32) {
    %c1_i32 = arith.constant 1 : i32
    %0 = arith.addi %arg1, %c1_i32 : i32
    %c2_i32 = arith.constant 2 : i32
    %1 = arith.muli %0, %c2_i32 : i32
    %c1_i32_0 = arith.constant 1 : i32
    %2 = arith.minsi %1, %c1_i32_0 : i32
    %c0_i32 = arith.constant 0 : i32
    %c0_i32_1 = arith.constant 0 : i32
    %c0_i32_2 = arith.constant 0 : i32
    return %arg0, %c0_i32, %2, %c0_i32_1 : i32, i32, i32, i32
  }
  func.func @transform_2(%arg0: i32, %arg1: i32) -> (i32, i32, i32) {
    %c0_i32 = arith.constant 0 : i32
    %c0_i32_0 = arith.constant 0 : i32
    return %arg0, %arg1, %c0_i32 : i32, i32, i32
  }
  func.func @transform_3(%arg0: i32, %arg1: i32) -> (i32, i32, i32, i32) {
    %c0_i32 = arith.constant 0 : i32
    %c0_i32_0 = arith.constant 0 : i32
    %c0_i32_1 = arith.constant 0 : i32
    return %arg0, %arg1, %c0_i32, %c0_i32_0 : i32, i32, i32, i32
  }
  func.func @transform_4(%arg0: i32, %arg1: i32) -> (i32, i32, i32, i32) {
    %c0_i32 = arith.constant 0 : i32
    %c0_i32_0 = arith.constant 0 : i32
    %c0_i32_1 = arith.constant 0 : i32
    return %arg0, %arg1, %c0_i32, %c0_i32_0 : i32, i32, i32, i32
  }
}

</mosaic_0001>

<bundles_post_ra>
// kernel: sobel_filter.1
= control target key start
LH: loop header
LB: loop body
LE: loop exit
PB: predicated region body
PF: predicated region fallthrough
CT: control target
= control target key end

     0   :  { %10 = vsyncpa [#allocation3], 0  ;;  %s1062_s0 = inlined_call_operand.hbm [shape: f32[2,3,16,16], index: 0, kind: input, shape index: {}, may-alias: {0,1}]   ;;  %s1063_s1 = inlined_call_operand.hbm [shape: f32[2,3,16,16], index: 1, kind: input, shape index: {}, may-alias: {0,1}]   ;;  %s1064_s2 = inlined_call_operand.vmem [shape: f32[2,14,14], index: 2, kind: output, shape index: {0}]   ;;  %s1065_s3 = inlined_call_operand.vmem [shape: f32[2,1,8,128], index: 3, kind: output, shape index: {1}]   ;;  %s1066_s4 = inlined_call_operand.vmem [shape: f32[2,1,8,128], index: 4, kind: output, shape index: {2}]  }
   0x1   :  { %12 = vsyncpa [#allocation3 + $0x1], 0 }
   0x2   :  { %13 = vsyncpa [#allocation5], 0 }
   0x3   :  { %15 = vsyncpa [#allocation5 + $0x1], 0  ;;  %s920_s15 = smov 0   ;;  %s922_s16 = smov 0  }
   0x4   :  { %s924_s17 = smov 0   ;;  %s926_s18 = smov 0  }
   0x5   :  { %s928_s19 = smov 0   ;;  %s930_s20 = smov 0  }
   0x6 LB: > { %s680_s21 = sadd.s32 4294967295, %s886_s20   ;;  %s33_s22 = sadd.s32 1, %s882_s19  ;;  %s886_s20 = sphi %s930_s20, %s21_s20   ;;  %s882_s19 = sphi %s928_s19, %s1074_s19   ;;  %s878_s18 = sphi %s926_s18, %s1073_s18   ;;  %s874_s17 = sphi %s924_s17, %s1072_s17   ;;  %s870_s16 = sphi %s922_s16, %s1071_s16   ;;  %s866_s15 = sphi %s920_s15, %s1070_s15  }
   0x7   : > { %p35_p0 = scmp.ge.s32.totalorder %s33_s22, 2  ;;  %s42_s23 = sadd.s32 1, %s874_s17 }
   0x8   : > { %p49_p1 = scmp.ne.s32.totalorder %s874_s17, %s870_s16  ;;  %p50_p2 = scmp.eq.s32.totalorder %s886_s20, 0 }
   0x9   : > { %s1076_s22 = smov (%p35_p0, %s33_s22), 0  ;;  %p55_p4 = scmp.ne.s32.totalorder %s870_s16, %s866_s15 }
   0xa   : > { %p51_p3 = por %p50_p2, %p49_p1  ;;  %s37_s24 = ssub.s32 %s882_s19, %s1076_s22 }
   0xb   : > { %p56_p5 = scmp.eq.s32.totalorder %s680_s21, 0  ;;  %p40_p6 = scmp.eq.s32.totalorder %s37_s24, 0 }
   0xc   : > { %p717_p8 = scmp.lt.s32.totalorder %s886_s20, 2  ;;  %s968_s27 = sand.u32 1, %s874_s17  }
   0xd   : > { %p959_p7 = por %p56_p5, %p55_p4  ;;  %s697_s28 = smul.u32 768, %s882_s19 }
   0xe   : > { %s965_s26 = scalar_select %p40_p6, %s874_s17, %s42_s23  }
   0xf   : > { %s696_s29 = smul.u32 48, %s968_s27  ;;  %s211_s6 = scalar_lea.hbm %s1062_s0, %s697_s28 }
  0x10   : > { %p977_p9 = pnand %p717_p8, %p51_p3  ;;  %s200_s10 = scalar_lea.sflag [#allocation3], %s968_s27 }
  0x11   : > { %s203_s8 = scalar_lea.vmem [#allocation2], %s696_s29  ;;  %s888_s12 = smov [#allocation2]  }
  0x12   : > { %s212_s9 = sshll.u32 %s203_s8, 4  ;;  %p778_p10 = pneg %p977_p9  ;;  %s213_s9 = int_to_ptr.vmem [resolvable:$true] %s212_s9 }
  0x13   : > { %s789_s11 = scalar_lea.vmem %s213_s9, 768  ;;  %s794_s13 = sshll.u32 %s888_s12, 4  ;;  %s795_s13 = int_to_ptr.vmem [resolvable:$false] %s794_s13 }
  0x14   : > { %p790_p11 = scmp.ne.s32.totalorder %s213_s9, %s789_s11  ;;  %s796_s14 = scalar_lea.vmem %s795_s13, 1536 }
  0x15   : > { %p797_p0 = scmp.lt.s32.totalorder %s213_s9, %s795_s13  ;;  %p798_p1 = scmp.lt.s32.totalorder %s796_s14, %s789_s11 }
  0x16   : > { %p792_p12 = pnand %p790_p11, %p778_p10 }
  0x17   : > { %p799_p2 = por %p798_p1, %p797_p0 }
  0x18   : > { %p793_p13 = pneg %p792_p12 }
  0x1a   : > { %p800_p3 = pnand %p799_p2, %p793_p13 }
  0x1c   : > { %803 = shalt.err (!%p800_p3)
}
  0x1d   : > { %s889_s15 = smov 128   ;;  %s890_s21 = smov 8  }
  0x1e   : > { %713 = dma.hbm_to_vmem [thread:$0]  (!%p977_p9), %s211_s6, 768, %s213_s9, %s200_s10, %s889_s15, %s889_s15, %s890_s21  }
  0x1f   : > { %p686_p4 = scmp.ge.s32.totalorder %s886_s20, 1  ;;  %p246_p5 = scmp.lt.s32.totalorder %s886_s20, 3 }
  0x20   : > { %s698_s23 = smul.u32 24, %s968_s27  ;;  %s694_s24 = sadd.s32 128, %s697_s28 }
  0x21   : > { %p997_p6 = pnand %p686_p4, %p246_p5  ;;  %s237_s8 = scalar_lea.hbm %s1063_s1, %s694_s24 }
  0x22   : > { %s226_s11 = scalar_lea.vmem [#allocation4], %s698_s23  ;;  %s223_s13 = scalar_lea.sflag [#allocation5], %s968_s27 }
  0x23   : > { %s238_s12 = sshll.u32 %s226_s11, 4  ;;  %s891_s6 = smov [#allocation4]   ;;  %s239_s12 = int_to_ptr.vmem [resolvable:$true] %s238_s12 }
  0x24   : > { %s817_s14 = scalar_lea.vmem %s239_s12, 384  ;;  %s822_s28 = sshll.u32 %s891_s6, 4  ;;  %s823_s28 = int_to_ptr.vmem [resolvable:$false] %s822_s28 }
  0x25   : > { %p818_p8 = scmp.ne.s32.totalorder %s239_s12, %s817_s14  ;;  %s824_s9 = scalar_lea.vmem %s823_s28, 768 }
  0x26   : > { %p825_p13 = scmp.lt.s32.totalorder %s239_s12, %s823_s28  ;;  %p826_p0 = scmp.lt.s32.totalorder %s824_s9, %s817_s14 }
  0x27   : > { %p820_p11 = pnand %p818_p8, %p778_p10 }
  0x28   : > { %p827_p1 = por %p826_p0, %p825_p13 }
  0x29   : > { %p821_p12 = pneg %p820_p11 }
  0x2b   : > { %p828_p2 = pnand %p827_p1, %p821_p12 }
  0x2d   : > { %831 = shalt.err (!%p828_p2)
}
  0x2e   : > { %s892_s10 = smov 256   ;;  %250 = sbr.rel (%p997_p6) target bundleno = 422 (0x1a6), region = 28 }
  0x2f   : > { %716 = dma.hbm_to_vmem [thread:$0]  (!%p977_p9), %s237_s8, 384, %s239_s12, %s223_s13, %s892_s10, %s889_s15, %s890_s21  }
  0x30   : > { %s252_s27 = sand.u32 (!%p997_p6), 1, %s870_s16  }
  0x31   : > { %s700_s23 = smul.u32 (!%p997_p6), 48, %s252_s27  ;;  %s253_s24 = scalar_lea.sflag (!%p997_p6), [#allocation3], %s252_s27 }
  0x33   : > { %s256_s30 = scalar_lea.vmem [#allocation2], %s700_s23 }
  0x34   : > { %857 = dma.done.wait (%p959_p7), %s253_s24, 768  }
  0x35   : > { %859 = vsyncadd (%p959_p7), %s253_s24, 4294966528  ;;  %s701_s5 = smul.u32 24, %s252_s27  ;;  %s262_s7 = scalar_lea.sflag [#allocation5], %s252_s27 }
  0x37   : > { %s265_s11 = scalar_lea.vmem [#allocation4], %s701_s5 }
  0x38   : > { %861 = dma.done.wait (%p959_p7), %s262_s7, 384  }
  0x39   : > { %863 = vsyncadd (%p959_p7), %s262_s7, 4294966912  ;;  %v343_v0 = vld [vmem:[%s256_s30 + $0x8] sm:$0xff]  ;;  %v345_v1 = vld [vmem:[%s256_s30 + $0x18] sm:$0xff]  ;;  %vm372_vm0 = vcmask 1045504   ;;  %vm360_vm1 = vcmask 1046528   ;;  %s893_s25 = smov 126   ;;  %v438_v53 = vlaneseq }
  0x3a   : > { %v347_v2 = vld [vmem:[%s256_s30 + $0x28] sm:$0xff]  ;;  %v350_v5 = vld [vmem:[%s265_s11 + $0x10] sm:$0xff]  ;;  %v352_v6 = vadd.f32 %v345_v1, %v343_v0  ;;  %v342_v8 = vld [vmem:[%s256_s30] sm:$0xff]  ;;  %s894_s15 = smov 127   ;;  %p319_p7 = scmp.lt.s32.totalorder %s878_s18, 1  ;;  %vm434_vm3 = vcmask 113664  }
  0x3b   : > { %v348_v3 = vld [vmem:[%s265_s11] sm:$0xff]  ;;  %v349_v4 = vld [vmem:[%s265_s11 + $0x8] sm:$0xff]  ;;  %v439_v54 = vshrl.u32 %v438_v53, 7 }
  0x3c   : > { %v355_v7 = vadd.f32 %v349_v4, %v348_v3  ;;  %v344_v9 = vld [vmem:[%s256_s30 + $0x10] sm:$0xff]  ;;  %v346_v10 = vld [vmem:[%s256_s30 + $0x20] sm:$0xff]  ;;  %v354_v11 = vadd.f32 %v352_v6, %v347_v2  ;;  %s1078_s18 = smov (!%p319_p7, %s878_s18), 1 }
  0x3d   : > { %v351_v12 = vadd.f32 %v344_v9, %v342_v8  ;;  %v440_v55 = vadd.s32 8, %v439_v54  ;;  %s695_s21 = sshll.u32 %s1078_s18, 4  ;;  %s689_s13 = sshll.u32 %s1078_s18, 3 }
  0x3e   : > { %v356_v13 = vadd.f32 %v355_v7, %v350_v5  ;;  %v374_v14 = vrot.slane %v354_v11, 2  ;;  %v362_v15 = vrot.slane %v354_v11, 1  ;;  %s326_s12 = scalar_lea.vmem %s1064_s2, %s695_s21  ;;  %s334_s28 = scalar_lea.vmem %s1065_s3, %s689_s13 }
  0x3f   : > { %v353_v16 = vadd.f32 %v351_v12, %v346_v10  ;;  %vm445_vm5 = vcmp.lt.s32.totalorder %v440_v55, 14  ;;  %s341_s23 = scalar_lea.vmem %s1066_s4, %s689_s13 }
  0x40   : > { %v376_v17 = vrot.slane %v356_v13, 2  ;;  %v364_v18 = vrot.slane %v356_v13, 1 }
  0x41   : > { %v373_v19 = vrot.slane %v353_v16, 2  ;;  %v361_v20 = vrot.slane %v353_v16, 1 }
  0x42   : > { %v377_v21 = vsel %vm372_vm0, %v374_v14, %v376_v17  ;;  %v365_v22 = vsel %vm360_vm1, %v362_v15, %v364_v18 }
  0x43   : > { %v383_v23 = vsub.f32 %v354_v11, %v377_v21  ;;  %v369_v24 = vadd.f32 %v365_v22, %v354_v11  ;;  %v375_v25 = vsel %vm372_vm0, %v373_v19, %v374_v14  ;;  %v363_v26 = vsel %vm360_vm1, %v361_v20, %v362_v15 }
  0x44   : > { %v368_v27 = vadd.f32 %v363_v26, %v353_v16  ;;  %v382_v29 = vsub.f32 %v353_v16, %v375_v25 }
  0x45   : > { %408 = vrot.lane.b32.xlu1 %v383_v23, %s893_s25  ;;  %398 = vrot.lane.b32.xlu0 %v383_v23, %s894_s15  ;;  %v371_v28 = vadd.f32 %v369_v24, %v365_v22 }
  0x46   : > { %v370_v30 = vadd.f32 %v368_v27, %v363_v26 }
  0x47   : > { %v381_v31 = vadd.f32 %v377_v21, %v371_v28 }
  0x48   : > { %v380_v32 = vadd.f32 %v375_v25, %v370_v30 }
  0x49   : > { %388 = vrot.lane.b32.xlu1 %v381_v31, %s893_s25  ;;  %396 = vrot.lane.b32.xlu0 %v382_v29, %s894_s15 }
  0x4d   : > { %406 = vrot.lane.b32.xlu1 %v382_v29, %s893_s25  ;;  %386 = vrot.lane.b32.xlu0 %v380_v32, %s893_s25 }
  0xb7   : > { %v409_v33 = vpop.permute.xlu1 %408  ;;  %v399_v34 = vpop.permute.xlu0 %398 }
  0xb8   : > { %v403_v35 = vadd.f32 %v399_v34, %v383_v23 }
  0xba   : > { %v405_v36 = vadd.f32 %v403_v35, %v399_v34 }
  0xbb   : > { %v389_v37 = vpop.permute.xlu1 %388  ;;  %v397_v38 = vpop.permute.xlu0 %396 }
  0xbc   : > { %v413_v39 = vadd.f32 %v409_v33, %v405_v36  ;;  %v393_v40 = vsub.f32 %v381_v31, %v389_v37  ;;  %v402_v41 = vadd.f32 %v397_v38, %v382_v29 }
  0xbe   : > { %v417_v42 = vmul.f32 %v413_v39, %v413_v39  ;;  %v415_v43 = vmul.f32 %v393_v40, %v393_v40  ;;  %v404_v44 = vadd.f32 %v402_v41, %v397_v38 }
  0xbf   : > { %v407_v45 = vpop.permute.xlu1 %406  ;;  %v387_v46 = vpop.permute.xlu0 %386 }
  0xc0   : > { %v419_v47 = vadd.f32 %v417_v42, %v415_v43  ;;  %v412_v48 = vadd.f32 %v407_v45, %v404_v44  ;;  %v392_v49 = vsub.f32 %v380_v32, %v387_v46 }
  0xc2   : > { %772 = vrsqrt.f32 %v419_v47  ;;  %v416_v50 = vmul.f32 %v412_v48, %v412_v48  ;;  %v414_v51 = vmul.f32 %v392_v49, %v392_v49  ;;  %vm429_vm2 = vcmp.eq.f32.partialorder %v419_v47, inf }
  0xc3   : > { %v432_v58 = vand.u32 2147483648, %v419_v47  ;;  %vm431_vm4 = vcmp.eq.f32.partialorder %v419_v47, 0.0 }
  0xc4   : > { %v418_v52 = vadd.f32 %v416_v50, %v414_v51 }
  0xc6   : > { %774 = vrsqrt.f32 %v418_v52  ;;  %vm422_vm6 = vcmp.eq.f32.partialorder %v418_v52, inf  ;;  %v425_v63 = vand.u32 2147483648, %v418_v52  ;;  %vm424_vm7 = vcmp.eq.f32.partialorder %v418_v52, 0.0 }
  0xcf   : > { %v773_v56 = vpop.eup %772 }
  0xd0   : > { %v428_v57 = vmul.f32 %v773_v56, %v419_v47 }
  0xd2   : > { %v430_v59 = vsel %vm429_vm2, %v419_v47, %v428_v57 }
  0xd3   : > { %v775_v60 = vpop.eup %774  ;;  %v433_v61 = vsel %vm431_vm4, %v432_v58, %v430_v59 }
  0xd4   : > { %v421_v62 = vmul.f32 %v775_v60, %v418_v52  ;;  %436 = vst.msk [vmem:[%s326_s12 + $0x8] sm:$0xff] %vm434_vm3, %v433_v61  ;;  %v461_v0 = vsel %vm445_vm5, %v433_v61, -inf  ;;  %v447_v1 = vsel %vm445_vm5, %v433_v61, inf }
  0xd5   : > { %v463_v5 = vsel %vm434_vm3, %v461_v0, -inf  ;;  %v449_v7 = vsel %vm434_vm3, %v447_v1, inf }
  0xd6   : > { %v423_v2 = vsel %vm422_vm6, %v418_v52, %v421_v62 }
  0xd7   : > { %v426_v3 = vsel %vm424_vm7, %v425_v63, %v423_v2 }
  0xd8   : > { %v462_v4 = vsel %vm434_vm3, %v426_v3, -inf  ;;  %v448_v6 = vsel %vm434_vm3, %v426_v3, inf  ;;  %435 = vst.msk [vmem:[%s326_s12] sm:$0xff] %vm434_vm3, %v426_v3 }
  0xd9   : > { %v464_v8 = vmax.f32 %v462_v4, %v463_v5  ;;  %v450_v9 = vmin.f32 %v448_v6, %v449_v7 }
  0xdb   : > { %465 = vmax.xlane.f32.xlu1 %v464_v8  ;;  %451 = vmin.xlane.f32.xlu0 %v450_v9 }
 0x164   : > { %v466_v10 = vpop.xlane.xlu1 %465  ;;  %v452_v11 = vpop.xlane.xlu0 %451 }
 0x165   : > { %v467_v12 = vrot.slane %v466_v10, 4  ;;  %v453_v13 = vrot.slane %v452_v11, 4 }
 0x167   : > { %v468_v14 = vmax.f32 %v466_v10, %v467_v12  ;;  %v454_v15 = vmin.f32 %v452_v11, %v453_v13 }
 0x169   : > { %v469_v16 = vrot.slane %v468_v14, 2  ;;  %v455_v17 = vrot.slane %v454_v15, 2 }
 0x16b   : > { %v470_v18 = vmax.f32 %v468_v14, %v469_v16  ;;  %v456_v19 = vmin.f32 %v454_v15, %v455_v17 }
 0x16d   : > { %v457_v20 = vrot.slane %v456_v19, 1  ;;  %v471_v21 = vrot.slane %v470_v18, 1 }
 0x16f   : > { %v458_v22 = vmin.f32 %v456_v19, %v457_v20  ;;  %v472_v23 = vmax.f32 %v470_v18, %v471_v21 }
 0x171   : > { %702 = vpush %v458_v22 }
 0x172   : > { %704 = vpush %v472_v23 }
 0x1a2   : > { %s703_s9 = spop %702 }
 0x1a3   : > { %v474_v24 = vstv %s703_s9  ;;  %s705_s24 = spop %704 }
 0x1a4   : > { %475 = vst [vmem:[%s334_s28] sm:$0xff] %v474_v24  ;;  %v476_v25 = vstv %s705_s24 }
 0x1a5   : > { %477 = vst [vmem:[%s341_s23] sm:$0xff] %v476_v25 }
 0x1a6 PF: > { %s21_s20 = sadd.s32 1, %s886_s20   ;;  %s1070_s15 = smov %s870_s16 }
 0x1a7   : > { %p18_p9 = scmp.ge.s32.totalorder %s21_s20, 4   ;;  %s1071_s16 = smov %s874_s17 }
 0x1a8   : > { %s1072_s17 = smov %s965_s26  ;;  %s1073_s18 = smov %s882_s19 }
 0x1a9   : > { %s1074_s19 = smov %s1076_s22  ;;  %20 = sbr.rel (!%p18_p9) target bundleno = 6 (0x6), region = 105 }
 0x1ae   :  { %548 = vsyncpa [#allocation3], 1 }
 0x1af   :  { %550 = vsyncpa [#allocation3 + $0x1], 1 }
 0x1b0   :  { %551 = vsyncpa [#allocation5], 1 }
 0x1b1   :  { %553 = vsyncpa [#allocation5 + $0x1], 1 }

</bundles_post_ra>
